<compile_context>
chip_gen: v7x
topology: tpu7x:2x2x1
jax: 0.10.0
libtpu: 0.0.40
codegen_flags: <defaults>
</compile_context>

<pallas_src>
import math

import jax
import jax.numpy as jnp
from jax.experimental import pallas as pl
from jax.experimental.pallas import tpu as pltpu


def _pos_embed_fourier1d_init(cutoff: float, n: int) -> jnp.ndarray:
    # torch: exp(linspace(0, -log(cutoff), n)) with shape (1, 1, n); we keep the (n,) vector.
    return jnp.exp(jnp.linspace(0.0, -math.log(cutoff), n)).astype(jnp.float32)


def _make_rope_kernel(H: int, D: int):
    def kernel(coords_ref, fmat_ref, rot_ref, q_ref, k_ref, q_out, k_out):
        # coords_ref: (n_tile, D) f32   fmat_ref: (D, C) f32   rot_ref: (C, C) f32
        # q_ref/k_ref/q_out/k_out: (H, n_tile, C)
        coords = coords_ref[...]                                   # float32
        ang = coords[:, 0:1] * fmat_ref[0:1, :]                    # (n_tile, C)
        for d in range(1, D):                                      # static loop over coord dims
            ang = ang + coords[:, d:d + 1] * fmat_ref[d:d + 1, :]
        # fmat already carries the pi/2 factor and the repeat_interleave(2) pattern,
        # so cos/sin come out at full C width directly.
        # NOTE: torch divides by sqrt(len(freq)); freq has shape (1, 1, n//2) so
        # len(freq) == 1 and the division is a no-op (kept faithful, omitted).
        co = jnp.cos(ang)                                          # (n_tile, C) f32
        si = jnp.sin(ang)
        rot = rot_ref[...]                                         # signed pair-swap matrix

        # Trig is shared across heads; per head: one tiny MXU matmul + VPU FMA.
        for h in range(H):                                         # static, H is small
            for x_ref, o_ref in ((q_ref, q_out), (k_ref, k_out)):
                x = x_ref[h].astype(jnp.float32)                   # (n_tile, C)
                x_rot = jnp.dot(x, rot, preferred_element_type=jnp.float32)  # rotate_half(x)
                o_ref[h] = (x * co + x_rot * si).astype(o_ref.dtype)

    return kernel


def _pick_n_tile(N, H, C, itemsize, vmem_budget_bytes=8 * 1024 * 1024):
    # Per-step residency ~ 4 q/k blocks * 2 (double buffer) * H * n_tile * C * itemsize.
    # Budget is conservative so it also fits v7x's 32 MiB default-scoped VMEM.
    max_rows = max(8, vmem_budget_bytes // (8 * H * C * max(int(itemsize), 4)))
    if N <= max_rows or N % 8 != 0:
        return N
    t = min((max_rows // 8) * 8, N)
    while t >= 8:
        if N % t == 0:
            return t
        t -= 8
    return N


def rotary_positional_encoding(q, k, coords, freqs, n_pos):
    """Pallas implementation of RotaryPositionalEncoding.forward."""
    B, H, N, C = q.shape
    Bc, Nc, D = coords.shape
    assert (B, N) == (Bc, Nc)
    assert D == len(freqs) == len(n_pos)
    assert all(n % 2 == 0 for n in n_pos), "n_pos must be even"
    assert C == sum(n_pos)

    # (D, C) frequency matrix: row d holds (pi/2) * repeat_interleave(freqs[d], 2)
    # inside dim d's channel range and zeros elsewhere (avoids in-kernel concat).
    rows = []
    off = 0
    for f, n in zip(freqs, n_pos):
        row = jnp.zeros((C,), jnp.float32)
        rep = jnp.repeat(jnp.asarray(f, jnp.float32).reshape(-1), 2)   # (n,)
        row = row.at[2 * off:2 * off + n].set(0.5 * math.pi * rep)
        rows.append(row)
        off += n // 2
    fmat = jnp.stack(rows, axis=0)                                     # (D, C) f32

    # rotate_half as a signed pair-swap permutation matrix (exact 0/+-1 entries):
    #   (x @ rot)[2i] = -x[2i+1],  (x @ rot)[2i+1] = x[2i]
    ev = jnp.arange(0, C, 2)
    rot = jnp.zeros((C, C), jnp.float32)
    rot = rot.at[ev + 1, ev].set(-1.0)
    rot = rot.at[ev, ev + 1].set(1.0)

    n_tile = _pick_n_tile(N, H, C, jnp.dtype(q.dtype).itemsize)
    num_n = N // n_tile

    qk_spec = pl.BlockSpec((None, H, n_tile, C), lambda b, t: (b, 0, t, 0))
    kernel = _make_rope_kernel(H, D)

    q2, k2 = pl.pallas_call(
        kernel,
        out_shape=(jax.ShapeDtypeStruct((B, H, N, C), q.dtype),
                   jax.ShapeDtypeStruct((B, H, N, C), k.dtype)),
        grid=(B, num_n),
        in_specs=[
            pl.BlockSpec((None, n_tile, D), lambda b, t: (b, t, 0)),   # coords (f32)
            pl.BlockSpec((D, C), lambda b, t: (0, 0)),                 # freq matrix (param)
            pl.BlockSpec((C, C), lambda b, t: (0, 0)),                 # rotate-half matrix
            qk_spec,                                                   # q
            qk_spec,                                                   # k
        ],
        out_specs=(qk_spec, qk_spec),
        compiler_params=pltpu.CompilerParams(
            dimension_semantics=("parallel", "parallel")),
    )(coords.astype(jnp.float32), fmat, rot, q, k)
    return q2, k2


# ------------------ pure-JAX reference (mirrors the torch module) ------------------
def _rotate_half_ref(x):
    shp = x.shape
    xr = x.reshape(*shp[:-1], shp[-1] // 2, 2)
    x1, x2 = xr[..., 0], xr[..., 1]
    return jnp.stack((-x2, x1), axis=-1).reshape(shp)


def rope_ref(q, k, coords, freqs):
    cos_parts, sin_parts = [], []
    for d, f in enumerate(freqs):
        ang = 0.5 * math.pi * coords[..., d][..., None] * f[None, None, :]
        scale = 1.0 / math.sqrt(1)  # torch len(freq) == 1 (leading dim of (1,1,n//2))
        cos_parts.append(jnp.cos(ang) * scale)
        sin_parts.append(jnp.sin(ang) * scale)
    co = jnp.repeat(jnp.concatenate(cos_parts, -1), 2, axis=-1)[:, None]
    si = jnp.repeat(jnp.concatenate(sin_parts, -1), 2, axis=-1)[:, None]
    q2 = q * co + _rotate_half_ref(q) * si
    k2 = k * co + _rotate_half_ref(k) * si
    return q2, k2


if __name__ == "__main__":
    # module defaults: cutoffs=(256,), n_pos=(32,) -> D=1, C=32
    cutoffs = (256.0,)
    n_pos = (32,)
    B, H, N = 2, 2, 8
    C = sum(n_pos)
    D = len(cutoffs)

    # deterministic parameter init (same formula as the torch module)
    freqs = [_pos_embed_fourier1d_init(c, n // 2) for c, n in zip(cutoffs, n_pos)]

    key = jax.random.PRNGKey(0)
    kq, kk, kc = jax.random.split(key, 3)
    q = jax.random.normal(kq, (B, H, N, C), dtype=jnp.float32)
    k = jax.random.normal(kk, (B, H, N, C), dtype=jnp.float32)
    coords = jax.random.uniform(kc, (B, N, D), dtype=jnp.float32,
                                minval=0.0, maxval=64.0)

    q2, k2 = rotary_positional_encoding(q, k, coords, freqs, n_pos)
    jax.block_until_ready((q2, k2))

    q2_ref, k2_ref = rope_ref(q, k, coords, freqs)
    assert jnp.allclose(q2, q2_ref, atol=1e-4, rtol=1e-4), "q2 mismatch vs reference"
    assert jnp.allclose(k2, k2_ref, atol=1e-4, rtol=1e-4), "k2 mismatch vs reference"

    print("KERNEL_OK")
</pallas_src>

<mosaic_0001>
module attributes {stable_mosaic.version = 11 : i64} {
  func.func @kernel(%arg0: i32, %arg1: i32, %arg2: memref<1x8x1xf32, #tpu.memory_space<vmem>>, %arg3: memref<1x32xf32, #tpu.memory_space<vmem>>, %arg4: memref<32x32xf32, #tpu.memory_space<vmem>>, %arg5: memref<1x2x8x32xf32, #tpu.memory_space<vmem>>, %arg6: memref<1x2x8x32xf32, #tpu.memory_space<vmem>>, %arg7: memref<1x2x8x32xf32, #tpu.memory_space<vmem>>, %arg8: memref<1x2x8x32xf32, #tpu.memory_space<vmem>>) attributes {dimension_semantics = [#tpu.dimension_semantics<parallel>, #tpu.dimension_semantics<parallel>], iteration_bounds = array<i64: 2, 1>, scalar_prefetch = 0 : i64, scratch_operands = 0 : i64, tpu.core_type = #tpu.core_type<tc>, window_params = [{transform_indices = @transform_0, window_bounds = array<i64: 1, 8, 1>}, {pipeline_mode = #tpu.pipeline_mode<synchronous>, transform_indices = @transform_1, window_bounds = array<i64: 1, 32>}, {pipeline_mode = #tpu.pipeline_mode<synchronous>, transform_indices = @transform_2, window_bounds = array<i64: 32, 32>}, {transform_indices = @transform_3, window_bounds = array<i64: 1, 2, 8, 32>}, {transform_indices = @transform_4, window_bounds = array<i64: 1, 2, 8, 32>}, {transform_indices = @transform_5, window_bounds = array<i64: 1, 2, 8, 32>}, {transform_indices = @transform_6, window_bounds = array<i64: 1, 2, 8, 32>}]} {
    %c0 = arith.constant 0 : index
    %c0_0 = arith.constant 0 : index
    %c0_1 = arith.constant 0 : index
    %0 = vector.load %arg2[%c0, %c0_0, %c0_1] : memref<1x8x1xf32, #tpu.memory_space<vmem>>, vector<1x8x1xf32>
    %1 = vector.shape_cast %0 : vector<1x8x1xf32> to vector<8x1xf32>
    %c0_2 = arith.constant 0 : index
    %c0_3 = arith.constant 0 : index
    %2 = vector.load %arg3[%c0_2, %c0_3] : memref<1x32xf32, #tpu.memory_space<vmem>>, vector<1x32xf32>
    %3 = vector.broadcast %1 : vector<8x1xf32> to vector<8x32xf32>
    %4 = vector.broadcast %2 : vector<1x32xf32> to vector<8x32xf32>
    %5 = arith.mulf %3, %4 : vector<8x32xf32>
    %6 = math.cos %5 : vector<8x32xf32>
    %7 = math.sin %5 : vector<8x32xf32>
    %c0_4 = arith.constant 0 : index
    %c0_5 = arith.constant 0 : index
    %8 = vector.load %arg4[%c0_4, %c0_5] : memref<32x32xf32, #tpu.memory_space<vmem>>, vector<32x32xf32>
    %c0_6 = arith.constant 0 : index
    %c0_7 = arith.constant 0 : index
    %c0_8 = arith.constant 0 : index
    %c0_9 = arith.constant 0 : index
    %9 = vector.load %arg5[%c0_6, %c0_7, %c0_8, %c0_9] : memref<1x2x8x32xf32, #tpu.memory_space<vmem>>, vector<1x1x8x32xf32>
    %10 = vector.shape_cast %9 : vector<1x1x8x32xf32> to vector<8x32xf32>
    %cst = arith.constant dense<0.000000e+00> : vector<8x32xf32>
    %11 = tpu.matmul %10, %8, %cst {dimension_numbers = #tpu.dot_dimension_numbers<[1], [0], [0], [1], [0, 0, 1, 1], [], []>} : vector<8x32xf32>, vector<32x32xf32>, vector<8x32xf32> -> vector<8x32xf32>
    %12 = arith.mulf %10, %6 : vector<8x32xf32>
    %13 = arith.mulf %11, %7 : vector<8x32xf32>
    %14 = arith.addf %12, %13 : vector<8x32xf32>
    %c0_10 = arith.constant 0 : index
    %c0_11 = arith.constant 0 : index
    %c0_12 = arith.constant 0 : index
    %c0_13 = arith.constant 0 : index
    %15 = vector.load %arg7[%c0_10, %c0_11, %c0_12, %c0_13] : memref<1x2x8x32xf32, #tpu.memory_space<vmem>>, vector<1x1x8x32xf32>
    %16 = vector.shape_cast %15 : vector<1x1x8x32xf32> to vector<8x32xf32>
    %17 = vector.shape_cast %14 : vector<8x32xf32> to vector<1x1x8x32xf32>
    tpu.vector_store %arg7[%c0_10, %c0_11, %c0_12, %c0_13], %17 {strides = array<i32>} : memref<1x2x8x32xf32, #tpu.memory_space<vmem>>, vector<1x1x8x32xf32>,
    %c0_14 = arith.constant 0 : index
    %c0_15 = arith.constant 0 : index
    %c0_16 = arith.constant 0 : index
    %c0_17 = arith.constant 0 : index
    %18 = vector.load %arg6[%c0_14, %c0_15, %c0_16, %c0_17] : memref<1x2x8x32xf32, #tpu.memory_space<vmem>>, vector<1x1x8x32xf32>
    %19 = vector.shape_cast %18 : vector<1x1x8x32xf32> to vector<8x32xf32>
    %cst_18 = arith.constant dense<0.000000e+00> : vector<8x32xf32>
    %20 = tpu.matmul %19, %8, %cst_18 {dimension_numbers = #tpu.dot_dimension_numbers<[1], [0], [0], [1], [0, 0, 1, 1], [], []>} : vector<8x32xf32>, vector<32x32xf32>, vector<8x32xf32> -> vector<8x32xf32>
    %21 = arith.mulf %19, %6 : vector<8x32xf32>
    %22 = arith.mulf %20, %7 : vector<8x32xf32>
    %23 = arith.addf %21, %22 : vector<8x32xf32>
    %c0_19 = arith.constant 0 : index
    %c0_20 = arith.constant 0 : index
    %c0_21 = arith.constant 0 : index
    %c0_22 = arith.constant 0 : index
    %24 = vector.load %arg8[%c0_19, %c0_20, %c0_21, %c0_22] : memref<1x2x8x32xf32, #tpu.memory_space<vmem>>, vector<1x1x8x32xf32>
    %25 = vector.shape_cast %24 : vector<1x1x8x32xf32> to vector<8x32xf32>
    %26 = vector.shape_cast %23 : vector<8x32xf32> to vector<1x1x8x32xf32>
    tpu.vector_store %arg8[%c0_19, %c0_20, %c0_21, %c0_22], %26 {strides = array<i32>} : memref<1x2x8x32xf32, #tpu.memory_space<vmem>>, vector<1x1x8x32xf32>,
    %c0_23 = arith.constant 0 : index
    %c1 = arith.constant 1 : index
    %c0_24 = arith.constant 0 : index
    %c0_25 = arith.constant 0 : index
    %27 = vector.load %arg5[%c0_23, %c1, %c0_24, %c0_25] : memref<1x2x8x32xf32, #tpu.memory_space<vmem>>, vector<1x1x8x32xf32>
    %28 = vector.shape_cast %27 : vector<1x1x8x32xf32> to vector<8x32xf32>
    %cst_26 = arith.constant dense<0.000000e+00> : vector<8x32xf32>
    %29 = tpu.matmul %28, %8, %cst_26 {dimension_numbers = #tpu.dot_dimension_numbers<[1], [0], [0], [1], [0, 0, 1, 1], [], []>} : vector<8x32xf32>, vector<32x32xf32>, vector<8x32xf32> -> vector<8x32xf32>
    %30 = arith.mulf %28, %6 : vector<8x32xf32>
    %31 = arith.mulf %29, %7 : vector<8x32xf32>
    %32 = arith.addf %30, %31 : vector<8x32xf32>
    %c0_27 = arith.constant 0 : index
    %c1_28 = arith.constant 1 : index
    %c0_29 = arith.constant 0 : index
    %c0_30 = arith.constant 0 : index
    %33 = vector.load %arg7[%c0_27, %c1_28, %c0_29, %c0_30] : memref<1x2x8x32xf32, #tpu.memory_space<vmem>>, vector<1x1x8x32xf32>
    %34 = vector.shape_cast %33 : vector<1x1x8x32xf32> to vector<8x32xf32>
    %35 = vector.shape_cast %32 : vector<8x32xf32> to vector<1x1x8x32xf32>
    tpu.vector_store %arg7[%c0_27, %c1_28, %c0_29, %c0_30], %35 {strides = array<i32>} : memref<1x2x8x32xf32, #tpu.memory_space<vmem>>, vector<1x1x8x32xf32>,
    %c0_31 = arith.constant 0 : index
    %c1_32 = arith.constant 1 : index
    %c0_33 = arith.constant 0 : index
    %c0_34 = arith.constant 0 : index
    %36 = vector.load %arg6[%c0_31, %c1_32, %c0_33, %c0_34] : memref<1x2x8x32xf32, #tpu.memory_space<vmem>>, vector<1x1x8x32xf32>
    %37 = vector.shape_cast %36 : vector<1x1x8x32xf32> to vector<8x32xf32>
    %cst_35 = arith.constant dense<0.000000e+00> : vector<8x32xf32>
    %38 = tpu.matmul %37, %8, %cst_35 {dimension_numbers = #tpu.dot_dimension_numbers<[1], [0], [0], [1], [0, 0, 1, 1], [], []>} : vector<8x32xf32>, vector<32x32xf32>, vector<8x32xf32> -> vector<8x32xf32>
    %39 = arith.mulf %37, %6 : vector<8x32xf32>
    %40 = arith.mulf %38, %7 : vector<8x32xf32>
    %41 = arith.addf %39, %40 : vector<8x32xf32>
    %c0_36 = arith.constant 0 : index
    %c1_37 = arith.constant 1 : index
    %c0_38 = arith.constant 0 : index
    %c0_39 = arith.constant 0 : index
    %42 = vector.load %arg8[%c0_36, %c1_37, %c0_38, %c0_39] : memref<1x2x8x32xf32, #tpu.memory_space<vmem>>, vector<1x1x8x32xf32>
    %43 = vector.shape_cast %42 : vector<1x1x8x32xf32> to vector<8x32xf32>
    %44 = vector.shape_cast %41 : vector<8x32xf32> to vector<1x1x8x32xf32>
    tpu.vector_store %arg8[%c0_36, %c1_37, %c0_38, %c0_39], %44 {strides = array<i32>} : memref<1x2x8x32xf32, #tpu.memory_space<vmem>>, vector<1x1x8x32xf32>,
    return
  }
  func.func @transform_0(%arg0: i32, %arg1: i32) -> (i32, i32, i32) {
    %c0_i32 = arith.constant 0 : i32
    %c0_i32_0 = arith.constant 0 : i32
    return %arg0, %arg1, %c0_i32 : i32, i32, i32
  }
  func.func @transform_1(%arg0: i32, %arg1: i32) -> (i32, i32) {
    %c0_i32 = arith.constant 0 : i32
    %c0_i32_0 = arith.constant 0 : i32
    %c0_i32_1 = arith.constant 0 : i32
    return %c0_i32, %c0_i32_0 : i32, i32
  }
  func.func @transform_2(%arg0: i32, %arg1: i32) -> (i32, i32) {
    %c0_i32 = arith.constant 0 : i32
    %c0_i32_0 = arith.constant 0 : i32
    %c0_i32_1 = arith.constant 0 : i32
    return %c0_i32, %c0_i32_0 : i32, i32
  }
  func.func @transform_3(%arg0: i32, %arg1: i32) -> (i32, i32, i32, i32) {
    %c0_i32 = arith.constant 0 : i32
    %c0_i32_0 = arith.constant 0 : i32
    %c0_i32_1 = arith.constant 0 : i32
    return %arg0, %c0_i32, %arg1, %c0_i32_0 : i32, i32, i32, i32
  }
  func.func @transform_4(%arg0: i32, %arg1: i32) -> (i32, i32, i32, i32) {
    %c0_i32 = arith.constant 0 : i32
    %c0_i32_0 = arith.constant 0 : i32
    %c0_i32_1 = arith.constant 0 : i32
    return %arg0, %c0_i32, %arg1, %c0_i32_0 : i32, i32, i32, i32
  }
  func.func @transform_5(%arg0: i32, %arg1: i32) -> (i32, i32, i32, i32) {
    %c0_i32 = arith.constant 0 : i32
    %c0_i32_0 = arith.constant 0 : i32
    %c0_i32_1 = arith.constant 0 : i32
    return %arg0, %c0_i32, %arg1, %c0_i32_0 : i32, i32, i32, i32
  }
  func.func @transform_6(%arg0: i32, %arg1: i32) -> (i32, i32, i32, i32) {
    %c0_i32 = arith.constant 0 : i32
    %c0_i32_0 = arith.constant 0 : i32
    %c0_i32_1 = arith.constant 0 : i32
    return %arg0, %c0_i32, %arg1, %c0_i32_0 : i32, i32, i32, i32
  }
}

</mosaic_0001>

<bundles_post_ra>
// kernel: tpu_custom_call.1
= control target key start
LH: loop header
LB: loop body
LE: loop exit
PB: predicated region body
PF: predicated region fallthrough
CT: control target
= control target key end

     0   :  { %12 = vsyncpa [#allocation3], 0  ;;  %s1913_s0 = inlined_call_operand.vmem [shape: f32[2,8,1], index: 0, kind: input, shape index: {}]   ;;  %s1914_s1 = inlined_call_operand.vmem [shape: f32[1,32], index: 1, kind: input, shape index: {}]   ;;  %s1915_s2 = inlined_call_operand.hbm [shape: f32[32,32], index: 2, kind: input, shape index: {}]   ;;  %s1916_s3 = inlined_call_operand.hbm [shape: f32[2,2,8,32], index: 3, kind: input, shape index: {}]   ;;  %s1917_s4 = inlined_call_operand.vmem [shape: f32[2,2,8,32], index: 4, kind: input, shape index: {}]   ;;  %s1918_s5 = inlined_call_operand.hbm [shape: f32[2,2,8,32], index: 5, kind: output, shape index: {0}]   ;;  %s1919_s6 = inlined_call_operand.hbm [shape: f32[2,2,8,32], index: 6, kind: output, shape index: {1}]  }
   0x1   :  { %13 = vsyncpa [#allocation6], 0 }
   0x2   :  { %15 = vsyncpa [#allocation6 + $0x1], 0 }
   0x3   :  { %16 = vsyncpa [#allocation4], 0 }
   0x4   :  { %18 = vsyncpa [#allocation4 + $0x1], 0 }
   0x5   :  { %19 = vsyncpa [#allocation9], 0 }
   0x6   :  { %21 = vsyncpa [#allocation9 + $0x1], 0  ;;  %s1582_s21 = smov 0   ;;  %s1584_s22 = smov 0  }
   0x7   :  { %s1586_s23 = smov 0   ;;  %s1588_s24 = smov 0  }
   0x8   :  { %s1590_s25 = smov 0   ;;  %s1592_s26 = smov 0  }
   0x9 LB: > { %s1117_s27 = sadd.s32 4294967295, %s1527_s26   ;;  %s1118_s28 = sadd.s32 4294967294, %s1527_s26   ;;  %s1527_s26 = sphi %s1592_s26, %s27_s26   ;;  %s1523_s25 = sphi %s1590_s25, %s1947_s25   ;;  %s1519_s24 = sphi %s1588_s24, %s1946_s24   ;;  %s1515_s23 = sphi %s1586_s23, %s1945_s23   ;;  %s1511_s22 = sphi %s1584_s22, %s1944_s22   ;;  %s1507_s21 = sphi %s1582_s21, %s1943_s21  }
   0xa   : > { %p131_p0 = scmp.ne.s32.totalorder %s1511_s22, %s1507_s21  ;;  %p1616_p1 = scmp.eq.s32.totalorder %s1117_s27, 0 }
   0xb   : > { %p1620_p2 = scmp.eq.s32.totalorder %s1117_s27, 1  ;;  %p191_p3 = scmp.eq.s32.totalorder %s1118_s28, 1 }
   0xc   : > { %s1926_s29 = scalar_select %p1616_p1, 1, 0 }
   0xd   : > { %s1927_s30 = scalar_select %p1620_p2, 1, 0 }
   0xe   : > { %p1626_p4 = por %p1616_p1, %p131_p0  ;;  %p1119_p5 = scmp.ge.s32.totalorder %s1527_s26, 1 }
   0xf   : > { %p1631_p6 = por %p191_p3, %p131_p0  ;;  %p226_p7 = scmp.lt.s32.totalorder %s1527_s26, 3 }
  0x10   : > { %s1928_s7 = scalar_select %p1626_p4, 1, 0 }
  0x11   : > { %s1929_s8 = scalar_select %p1631_p6, 1, 0 }
  0x12   : > { %p1636_p8 = pnand %p1119_p5, %p226_p7  ;;  %s1529_s10 = smov [#allocation2]  }
  0x13   : > { %s241_s11 = sshll.u32 %s1529_s10, 4  ;;  %s39_s13 = sadd.s32 1, %s1523_s25  ;;  %s242_s11 = int_to_ptr.vmem [resolvable:$true] %s241_s11 }
  0x14   : > { %s1930_s9 = scalar_select %p1636_p8, 1, 0 }
  0x15   : > { %p1264_p9 = pneg %p1636_p8  ;;  %s1351_s16 = scalar_lea.hbm %s1915_s2, 512 }
  0x16   : > { %p1352_p12 = scmp.ne.s32.totalorder %s1915_s2, %s1351_s16  ;;  %p1358_p5 = scmp.lt.u32.totalorder %s1351_s16, %s1915_s2 }
  0x17   : > { %p1645_p11 = pnand %p1264_p9, %p1616_p1 }
  0x19   : > { %p1353_p13 = pneg %p1645_p11 }
  0x1b   : > { %p1354_p0 = pnand %p1353_p13, %p1352_p12 }
  0x1d   : > { %p1355_p3 = pneg %p1354_p0 }
  0x1f   : > { %p1360_p7 = pnand %p1358_p5, %p1355_p3 }
  0x21   : > { %1363 = shalt.err (!%p1360_p7)
}
  0x22   : > { %s1364_s27 = scalar_lea.vmem %s242_s11, 512  ;;  %p1372_p4 = scmp.lt.s32.totalorder %s242_s11, %s242_s11 }
  0x23   : > { %p1365_p9 = scmp.ne.s32.totalorder %s242_s11, %s1364_s27  ;;  %p1373_p1 = scmp.lt.s32.totalorder %s1364_s27, %s1364_s27 }
  0x25   : > { %p1367_p10 = pnand %p1365_p9, %p1353_p13  ;;  %p1374_p8 = por %p1373_p1, %p1372_p4 }
  0x27   : > { %p1368_p6 = pneg %p1367_p10 }
  0x29   : > { %p1375_p2 = pnand %p1374_p8, %p1368_p6 }
  0x2b   : > { %1378 = shalt.err (!%p1375_p2)
}
  0x2c   : > { %s1924_s28 = smov 128   ;;  %s1925_s10 = smov 8  }
  0x2d   : > { %1267 = dma.hbm_to_vmem [thread:$0]  (!%p1645_p11), %s1915_s2, 512, %s242_s11, [#allocation3], %s1924_s28, %s1924_s28, %s1925_s10  }
  0x2e   : > { %p41_p1 = scmp.ge.s32.totalorder %s39_s13, 2  ;;  %s118_s16 = sadd.s32 1, %s1515_s23 }
  0x2f   : > { %p125_p2 = scmp.ne.s32.totalorder %s1515_s23, %s1511_s22  ;;  %p126_p4 = scmp.eq.s32.totalorder %s1527_s26, 0 }
  0x30   : > { %s1949_s13 = smov (%p41_p1, %s39_s13), 0  ;;  %p1933_p8 = scmp.ne.s32.totalorder %s1927_s30, 0 }
  0x31   : > { %p1675_p6 = por %p126_p4, %p125_p2  ;;  %s113_s18 = ssub.s32 %s1523_s25, %s1949_s13 }
  0x32   : > { %p1681_p10 = por %p1933_p8, %p125_p2  ;;  %p1280_p12 = scmp.lt.s32.totalorder %s1527_s26, 2 }
  0x33   : > { %p116_p11 = scmp.eq.s32.totalorder %s113_s18, 0  ;;  %s265_s11 = sand.u32 1, %s1515_s23  }
  0x34   : > { %s1122_s19 = sshll.u32 %s265_s11, 4  ;;  %s1158_s27 = sshll.u32 %s1523_s25, 8 }
  0x35   : > { %s1690_s20 = scalar_select %p116_p11, %s1515_s23, %s118_s16  }
  0x36   : > { %s1696_s28 = scalar_lea.hbm %s1916_s3, %s1158_s27  ;;  %s269_s30 = scalar_lea.vmem [#allocation5], %s1122_s19 }
  0x37   : > { %s277_s10 = sshll.u32 %s269_s30, 4  ;;  %p1702_p13 = pnand %p1280_p12, %p1675_p6  ;;  %s1698_s10 = int_to_ptr.vmem [resolvable:$true] %s277_s10 }
  0x38   : > { %s1706_s16 = scalar_lea.sflag [#allocation6], %s265_s11  ;;  %s1379_s14 = scalar_lea.hbm %s1696_s28, 256 }
  0x39   : > { %p1380_p0 = scmp.ne.s32.totalorder %s1696_s28, %s1379_s14  ;;  %p1381_p3 = pneg %p1702_p13 }
  0x3a   : > { %s1384_s17 = scalar_lea.hbm %s1916_s3, 512  ;;  %p1385_p9 = scmp.lt.u32.totalorder %s1696_s28, %s1916_s3 }
  0x3b   : > { %p1382_p5 = pnand %p1381_p3, %p1380_p0  ;;  %p1386_p1 = scmp.lt.u32.totalorder %s1384_s17, %s1379_s14 }
  0x3c   : > { %p1388_p4 = scmp.lt.u32.totalorder %s1379_s14, %s1696_s28 }
  0x3d   : > { %p1383_p7 = pneg %p1382_p5  ;;  %p1387_p2 = por %p1386_p1, %p1385_p9 }
  0x3f   : > { %p1389_p6 = por %p1388_p4, %p1387_p2 }
  0x41   : > { %p1390_p8 = pnand %p1389_p6, %p1383_p7 }
  0x43   : > { %1393 = shalt.err (!%p1390_p8)
}
  0x44   : > { %s1394_s11 = scalar_lea.vmem %s1698_s10, 256  ;;  %s1532_s19 = smov [#allocation5]  }
  0x45   : > { %p1395_p12 = scmp.ne.s32.totalorder %s1698_s10, %s1394_s11  ;;  %s1399_s27 = sshll.u32 %s1532_s19, 4  ;;  %s1400_s27 = int_to_ptr.vmem [resolvable:$false] %s1399_s27 }
  0x46   : > { %s1401_s15 = scalar_lea.vmem %s1400_s27, 512  ;;  %p1402_p5 = scmp.lt.s32.totalorder %s1698_s10, %s1400_s27 }
  0x47   : > { %p1397_p11 = pnand %p1395_p12, %p1381_p3  ;;  %p1403_p9 = scmp.lt.s32.totalorder %s1401_s15, %s1394_s11 }
  0x49   : > { %p1398_p0 = pneg %p1397_p11  ;;  %p1404_p1 = por %p1403_p9, %p1402_p5 }
  0x4b   : > { %p1405_p2 = pnand %p1404_p1, %p1398_p0 }
  0x4d   : > { %1408 = shalt.err (!%p1405_p2)
}
  0x4e   : > { %s1936_s14 = smov 8   ;;  %s1937_s17 = smov 128  }
  0x4f   : > { %1271 = dma.hbm_to_vmem [thread:$0]  (!%p1702_p13), %s1696_s28, 256, %s1698_s10, %s1706_s16, %s1937_s17, %s1937_s17, %s1936_s14  }
  0x50   : > { %p1938_p3 = scmp.ne.s32.totalorder %s1930_s9, 0 }
  0x51   : > { %p1939_p7 = scmp.ne.s32.totalorder (!%p1938_p3), %s1926_s29, 0 }
  0x52   : > { %300 = sbr.rel (%p1938_p3) target bundleno = 367 (0x16f), region = 40 }
  0x59   : > { %1490 = dma.done.wait (%p1939_p7), [#allocation3], 512  }
  0x5a   : > { %1492 = vsyncadd (%p1939_p7), [#allocation3], 4294966784  ;;  %s1744_s30 = sand.u32 1, %s1511_s22   ;;  %p1940_p13 = scmp.ne.s32.totalorder %s1928_s7, 0 }
  0x5b   : > { %s1747_s18 = sshll.u32 %s1744_s30, 4  ;;  %s307_s11 = scalar_lea.sflag [#allocation6], %s1744_s30 }
  0x5c   : > { %s310_s28 = scalar_lea.vmem [#allocation5], %s1747_s18 }
  0x5d   : > { %1494 = dma.done.wait (%p1940_p13), %s307_s11, 256  }
  0x5e   : > { %1496 = vsyncadd (%p1940_p13), %s307_s11, 4294967040  ;;  %p359_p4 = scmp.lt.s32.totalorder %s1519_s24, 1  ;;  %v1533_v0 = vmov 0   ;;  %v1534_v1 = vmov 0.0|0.0   ;;  %vm1535_vm0 = vmmov 0   ;;  %v1536_v2 = vmov 0.0  }
  0x5f   : > { %1346 = vset.pattern.permute.xlu0 %v1533_v0  ;;  %1226 = vmatprep.subr.bf16.mxu0 %v1534_v1  ;;  %v595_v4 = vld [vmem:[#allocation2] sm:$0xff]  ;;  %v596_v5 = vld [vmem:[#allocation2 + $0x8] sm:$0xff]  ;;  %v597_v7 = vld [vmem:[#allocation2 + $0x10] sm:$0xff]  ;;  %vm600_vm1 = vcmask 261120   ;;  %v1537_v28 = vmov 683565275  }
  0x60   : > { %s360_s29 = scalar_select %p359_p4, %s1519_s24, 1  ;;  %1232 = vmatprep.subr.bf16.mxu1 %v1534_v1  ;;  %1190 = vmatprep.mubr.msk.f32.mxu0 %vm1535_vm0, %v1536_v2  ;;  %v1227_v6 = vpack.c.bf16 %v596_v5, %v595_v4  ;;  %v598_v8 = vld [vmem:[#allocation2 + $0x18] sm:$0xff]  ;;  %v1767_v10 = vld [vmem:[%s310_s28] sm:$0xff]  ;;  %v1538_v30 = vmov 2475754826  }
  0x61   : > { %1201 = vmatprep.mubr.msk.f32.mxu1 %vm1535_vm0, %v1536_v2  ;;  %v1230_v9 = vpack.c.bf16 %v598_v8, %v597_v7  ;;  %v1781_v13 = vld [vmem:[%s310_s28 + $0x8] sm:$0xff]  ;;  %v1133_v14 = vld [vmem:[%s1914_s1] ss:$0 sm:$0xff]  ;;  %v1539_v32 = vmov 2131351028   ;;  %s351_s28 = scalar_lea.vmem [#allocation7], %s1747_s18 }
  0x62   : > { %s1130_s9 = sshll.u32 %s360_s29, 3  ;;  %s1159_s19 = sshll.u32 %s360_s29, 4  ;;  %1228 = vmatpush3.bf16.msra.mxu0 %v1227_v6  ;;  %1234 = vmatpush3.bf16.msra.mxu1 %v1227_v6  ;;  %v1540_v34 = vmov 2102212464   ;;  %v1541_v36 = vmov 920167782  }
  0x63   : > { %s365_s7 = scalar_lea.vmem %s1913_s0, %s1130_s9  ;;  %1229 = vmatprep.subr.bf16.mxu0 %v1534_v1  ;;  %1235 = vmatprep.subr.bf16.mxu1 %v1534_v1  ;;  %s373_s14 = scalar_lea.vmem %s1917_s4, %s1159_s19  ;;  %v1542_v43 = vmov 1326507024  }
  0x64   : > { %v374_v3 = vld [vmem:[%s365_s7] sm:$0xff]  ;;  %v1777_v12 = vld [vmem:[%s373_s14 + $0x8] sm:$0xff]  ;;  %s358_s29 = scalar_lea.vmem [#allocation8], %s1747_s18  ;;  %s1160_s9 = sshll.u32 %s1519_s24, 8 }
  0x65   : > { %378 = vperm.xlu0 %1346, %v374_v3   ;;  %v1769_v11 = vld [vmem:[%s373_s14] sm:$0xff]  ;;  %s936_s10 = sshll.u32 %s351_s28, 4  ;;  %s1823_s18 = scalar_lea.hbm %s1918_s5, %s1160_s9  ;;  %s1825_s10 = int_to_ptr.vmem [resolvable:$true] %s936_s10 }
  0x66   : > { %1231 = vmatpush3.bf16.msra.mxu0 %v1230_v9  ;;  %1237 = vmatpush3.bf16.msra.mxu1 %v1230_v9  ;;  %s953_s19 = sshll.u32 %s358_s29, 4  ;;  %s1830_s15 = scalar_lea.hbm %s1919_s6, %s1160_s9  ;;  %s1832_s19 = int_to_ptr.vmem [resolvable:$true] %s953_s19 }
  0x67   : > { %1238 = vmatprep.subr.bf16.mxu0 %v1534_v1  ;;  %1244 = vmatprep.subr.bf16.mxu1 %v1534_v1  ;;  %s917_s14 = scalar_lea.sflag [#allocation4], %s1744_s30  ;;  %s1409_s17 = scalar_lea.vmem %s1825_s10, 256 }
  0x68   : > { %p1410_p6 = scmp.ne.s32.totalorder %s1825_s10, %s1409_s17  ;;  %s1543_s11 = smov [#allocation7]  }
  0x69   : > { %1191 = vmatmul.mubr.msk.f32.vlgmr.msra.gmra.mrb[0].mxu0 %vm600_vm1, %v1767_v10  ;;  %1202 = vmatmul.mubr.msk.f32.vlgmr.msra.gmra.mrb[0].mxu1 %vm600_vm1, %v1769_v11  ;;  %s1413_s16 = sshll.u32 %s1543_s11, 4  ;;  %s1414_s16 = int_to_ptr.vmem [resolvable:$false] %s1413_s16 }
  0x6a   : > { %1240 = vmatpush3.bf16.msra.mxu0 %v1227_v6  ;;  %1246 = vmatpush3.bf16.msra.mxu1 %v1227_v6  ;;  %p1411_p8 = pnand %p1410_p6, %p1681_p10  ;;  %s1415_s7 = scalar_lea.vmem %s1414_s16, 512 }
  0x6b   : > { %1241 = vmatprep.subr.bf16.mxu0 %v1534_v1  ;;  %1247 = vmatprep.subr.bf16.mxu1 %v1534_v1  ;;  %p1416_p11 = scmp.lt.s32.totalorder %s1825_s10, %s1414_s16  ;;  %p1417_p0 = scmp.lt.s32.totalorder %s1415_s7, %s1409_s17 }
  0x6c   : > { %1212 = vmatprep.mubr.msk.f32.mxu0 %vm1535_vm0, %v1536_v2  ;;  %1223 = vmatprep.mubr.msk.f32.mxu1 %vm1535_vm0, %v1536_v2  ;;  %p1412_p12 = pneg %p1411_p8 }
  0x6d   : > { %p1418_p5 = por %p1417_p0, %p1416_p11 }
  0x6e   : > { %1243 = vmatpush3.bf16.msra.mxu0 %v1230_v9  ;;  %1249 = vmatpush3.bf16.msra.mxu1 %v1230_v9 }
  0x6f   : > { %p1419_p9 = pnand %p1418_p5, %p1412_p12 }
  0x71   : > { %1213 = vmatmul.mubr.msk.f32.vlgmr.msra.gmra.mrb[2].mxu0 %vm600_vm1, %v1781_v13  ;;  %1224 = vmatmul.mubr.msk.f32.vlgmr.msra.gmra.mrb[2].mxu1 %vm600_vm1, %v1777_v12 }
  0xe4   : > { %v379_v15 = vpop.permute.xlu0 %378 }
  0xe5   : > { %v1790_v16 = vmul.f32 %v1133_v14, %v379_v15 }
  0xe7   : > { %v391_v17 = vand.u32 2139095040, %v1790_v16  ;;  %v388_v19 = vand.u32 2147483647, %v1790_v16  ;;  %vm390_vm9 = vcmp.lt.s32.totalorder %v1790_v16, 0 }
  0xe9   : > { %v392_v18 = vshrl.u32 %v391_v17, 23  ;;  %v395_v22 = vand.u32 8388607, %v388_v19  ;;  %vm389_vm10 = vcmp.le.f32.partialorder %v388_v19, 0.7853982 }
  0xeb   : > { %v1134_v20 = vadd.s32 4294967169, %v392_v18  ;;  %v396_v25 = vor.u32 8388608, %v395_v22 }
  0xed   : > { %v398_v21 = vadd.s32 1, %v1134_v20  ;;  %v436_v45 = vshll.u32 %v396_v25, 8 }
  0xef   : > { %vm399_vm2 = vcmp.gt.s32.totalorder %v398_v21, 0 }
  0xf0   : > { %v400_v23 = vsel %vm399_vm2, %v398_v21, 0  ;;  %vm480_vm2 = vweird.f32 %v1790_v16 }
  0xf1   : > { %v402_v24 = vand.u32 31, %v400_v23  ;;  %v401_v26 = vshrl.u32 %v400_v23, 5 }
  0xf3   : > { %v403_v27 = vsub.s32 32, %v402_v24  ;;  %v405_v29 = vshll.u32 %v1537_v28, %v402_v24  ;;  %v408_v31 = vshll.u32 %v1538_v30, %v402_v24  ;;  %v411_v33 = vshll.u32 %v1539_v32, %v402_v24 }
  0xf4   : > { %v414_v35 = vshll.u32 %v1540_v34, %v402_v24  ;;  %v417_v37 = vshll.u32 %v1541_v36, %v402_v24  ;;  %vm420_vm3 = vcmp.lt.s32.totalorder %v401_v26, 1  ;;  %vm423_vm4 = vcmp.lt.s32.totalorder %v401_v26, 4 }
  0xf5   : > { %v404_v38 = vshrl.u32 %v1537_v28, %v403_v27  ;;  %v406_v39 = vshrl.u32 %v1538_v30, %v403_v27  ;;  %v409_v40 = vshrl.u32 %v1539_v32, %v403_v27  ;;  %v412_v41 = vshrl.u32 %v1540_v34, %v403_v27 }
  0xf6   : > { %v415_v42 = vshrl.u32 %v1541_v36, %v403_v27  ;;  %v418_v44 = vshrl.u32 %v1542_v43, %v403_v27  ;;  %vm421_vm5 = vcmp.lt.s32.totalorder %v401_v26, 2  ;;  %vm422_vm6 = vcmp.lt.s32.totalorder %v401_v26, 3 }
  0xf7   : > { %v407_v46 = vor.u32 %v406_v39, %v405_v29  ;;  %v410_v47 = vor.u32 %v409_v40, %v408_v31  ;;  %v413_v48 = vor.u32 %v412_v41, %v411_v33 }
  0xf8   : > { %v416_v49 = vor.u32 %v415_v42, %v414_v35  ;;  %v419_v50 = vor.u32 %v418_v44, %v417_v37 }
  0xf9   : > { %v424_v51 = vsel %vm420_vm3, %v404_v38, %v407_v46  ;;  %v425_v52 = vsel %vm423_vm4, %v413_v48, 2102212464  ;;  %v428_v53 = vsel %vm420_vm3, %v407_v46, %v410_v47  ;;  %v432_v54 = vsel %vm420_vm3, %v410_v47, %v413_v48 }
  0xfa   : > { %v426_v55 = vsel %vm422_vm6, %v410_v47, %v425_v52  ;;  %v429_v56 = vsel %vm423_vm4, %v416_v49, 920167782  ;;  %v433_v57 = vsel %vm423_vm4, %v419_v50, 1326507024 }
  0xfb   : > { %v430_v58 = vsel %vm422_vm6, %v413_v48, %v429_v56  ;;  %v434_v59 = vsel %vm422_vm6, %v416_v49, %v433_v57  ;;  %v427_v60 = vsel %vm421_vm5, %v424_v51, %v426_v55 }
  0xfc   : > { %v431_v61 = vsel %vm421_vm5, %v428_v53, %v430_v58  ;;  %v435_v62 = vsel %vm421_vm5, %v432_v54, %v434_v59  ;;  %v443_v3 = vmul.u32 %v436_v45, %v427_v60 }
  0xfd   : > { %v1796_v63 = vmul.u32.u64.low %v436_v45, %v435_v62  ;;  %v1797_v0 = vmul.u32.u64.high %v436_v45, %v435_v62, %v1796_v63  ;;  %v1799_v1 = vmul.u32.u64.low %v436_v45, %v431_v61  ;;  %v1800_v2 = vmul.u32.u64.high %v436_v45, %v431_v61, %v1799_v1 }
  0xff   : > { %vm445_vm7 = vc.u32 %v1797_v0, %v1799_v1  ;;  %v446_v4 = vadd.s32 1, %v1800_v2  ;;  %v444_v22 = vadd.s32 %v1799_v1, %v1797_v0 }
 0x101   : > { %v447_v5 = vsel %vm445_vm7, %v446_v4, %v1800_v2 }
 0x102   : > { %v448_v6 = vadd.s32 %v447_v5, %v443_v3 }
 0x104   : > { %v449_v7 = vadd.s32 536870912, %v448_v6 }
 0x106   : > { %v450_v8 = vshrl.u32 %v449_v7, 30 }
 0x108   : > { %v451_v9 = vshll.u32 %v450_v8, 30  ;;  %v474_v37 = vsub.s32 4, %v450_v8 }
 0x10a   : > { %v452_v14 = vsub.s32 %v448_v6, %v451_v9  ;;  %v475_v38 = vsel %vm390_vm9, %v474_v37, %v450_v8 }
 0x10b   : > { %v477_v39 = vsel %vm389_vm10, 0, %v475_v38 }
 0x10c   : > { %v454_v15 = vsub.s32 0, %v452_v14  ;;  %v584_v41 = vadd.s32 3, %v477_v39  ;;  %v481_v43 = vand.u32 3, %v477_v39 }
 0x10e   : > { %v1135_v17 = vmin.u32 %v454_v15, %v452_v14  ;;  %v585_v46 = vand.u32 3, %v584_v41  ;;  %vm483_vm11 = vcmp.eq.s32.totalorder %v481_v43, 0  ;;  %vm486_vm12 = vcmp.eq.s32.totalorder %v481_v43, 2 }
 0x10f   : > { %vm482_vm15 = vcmp.lt.s32.totalorder %v481_v43, 2 }
 0x110   : > { %v456_v18 = vclz %v1135_v17  ;;  %vm587_vm13 = vcmp.eq.s32.totalorder %v585_v46, 0  ;;  %vm590_vm14 = vcmp.eq.s32.totalorder %v585_v46, 2  ;;  %vm586_vm0 = vcmp.lt.s32.totalorder %v585_v46, 2 }
 0x112   : > { %v1136_v20 = vadd.s32 4294967294, %v456_v18 }
 0x114   : > { %vm1137_vm8 = vcmp.lt.s32.totalorder %v1136_v20, 0 }
 0x115   : > { %v459_v21 = vsel %vm1137_vm8, 0, %v1136_v20 }
 0x116   : > { %v460_v23 = vsub.s32 32, %v459_v21  ;;  %v464_v24 = vsub.s32 4294967266, %v459_v21  ;;  %v461_v25 = vshll.u32 %v452_v14, %v459_v21 }
 0x118   : > { %v462_v26 = vshrl.u32 %v444_v22, %v460_v23  ;;  %v465_v27 = vadd.s32 127, %v464_v24 }
 0x11a   : > { %v463_v28 = vor.u32 %v462_v26, %v461_v25  ;;  %v466_v29 = vshll.u32 %v465_v27, 23 }
 0x11c   : > { %v467_v30 = vor.u32 4788187, %v466_v29  ;;  %v470_v32 = vcvt.s32.f32 %v463_v28 }
 0x11e   : > { %v468_v31 = vand.u32 2147483647, %v467_v30 }
 0x120   : > { %v471_v33 = vmul.f32 %v470_v32, %v468_v31 }
 0x122   : > { %v472_v34 = vxor.u32 2147483648, %v471_v33 }
 0x124   : > { %v473_v35 = vsel %vm390_vm9, %v472_v34, %v471_v33 }
 0x125   : > { %v476_v36 = vsel %vm389_vm10, %v1790_v16, %v473_v35 }
 0x126   : > { %1347 = vcosq.f32 %v476_v36 }
 0x127   : > { %1349 = vsinq.f32 %v476_v36 }
 0x130   : > { %v1348_v40 = vpop.eup %1347 }
 0x131   : > { %v1350_v42 = vpop.eup %1349  ;;  %v487_v45 = vxor.u32 2147483648, %v1348_v40 }
 0x132   : > { %v484_v44 = vxor.u32 2147483648, %v1350_v42 }
 0x133   : > { %v488_v48 = vsel %vm486_vm12, %v487_v45, %v1350_v42  ;;  %v592_v49 = vsel %vm590_vm14, %v487_v45, %v1350_v42 }
 0x134   : > { %v485_v47 = vsel %vm483_vm11, %v1348_v40, %v484_v44  ;;  %v589_v19 = vsel %vm587_vm13, %v1348_v40, %v484_v44 }
 0x135   : > { %v489_v50 = vsel %vm482_vm15, %v485_v47, %v488_v48  ;;  %v593_v51 = vsel %vm586_vm0, %v589_v19, %v592_v49 }
 0x136   : > { %v490_v52 = vsel %vm480_vm2, nan, %v489_v50  ;;  %v594_v53 = vsel %vm480_vm2, nan, %v593_v51 }
 0x137   : > { %v674_v56 = vmul.f32 %v1767_v10, %v490_v52  ;;  %v752_v58 = vmul.f32 %v1769_v11, %v490_v52  ;;  %v831_v10 = vmul.f32 %v1781_v13, %v490_v52  ;;  %v911_v11 = vmul.f32 %v1777_v12, %v490_v52 }
 0x13c   : > { %v670_v54 = vpop.f32.mrb[0].mxu0  ;;  %v748_v55 = vpop.f32.mrb[0].mxu1 }
 0x13d   : > { %v675_v57 = vmul.f32 %v670_v54, %v594_v53  ;;  %v753_v59 = vmul.f32 %v748_v55, %v594_v53  ;;  %v1192_v60 = vpop.f32.mrb[1].mxu0  ;;  %v1203_v61 = vpop.f32.mrb[1].mxu1 }
 0x13f   : > { %v676_v62 = vadd.f32 %v675_v57, %v674_v56  ;;  %v754_v63 = vadd.f32 %v753_v59, %v752_v58 }
 0x141   : > { %677 = vst.msk [vmem:[%s351_s28] sm:$0xff] %vm600_vm1, %v676_v62  ;;  %755 = vst.msk [vmem:[%s358_s29] sm:$0xff] %vm600_vm1, %v754_v63 }
 0x144   : > { %v827_v16 = vpop.f32.mrb[2].mxu0  ;;  %v907_v0 = vpop.f32.mrb[2].mxu1 }
 0x145   : > { %v832_v1 = vmul.f32 %v827_v16, %v594_v53  ;;  %v912_v2 = vmul.f32 %v907_v0, %v594_v53  ;;  %v1214_v3 = vpop.f32.mrb[3].mxu0  ;;  %v1225_v4 = vpop.f32.mrb[3].mxu1 }
 0x147   : > { %v833_v5 = vadd.f32 %v832_v1, %v831_v10  ;;  %v913_v13 = vadd.f32 %v912_v2, %v911_v11 }
 0x149   : > { %1146 = vst.msk [vmem:[%s351_s28 + $0x8] sm:$0xff] %vm600_vm1, %v833_v5  ;;  %1149 = vst.msk [vmem:[%s358_s29 + $0x8] sm:$0xff] %vm600_vm1, %v913_v13 }
 0x14a   : > { %1422 = shalt.err (!%p1419_p9)
}
 0x14b   : > { %s1423_s28 = scalar_lea.hbm %s1823_s18, 256  ;;  %s1427_s24 = scalar_lea.hbm %s1918_s5, 512 }
 0x14c   : > { %p1424_p1 = scmp.ne.s32.totalorder %s1823_s18, %s1423_s28  ;;  %p1428_p7 = scmp.lt.u32.totalorder %s1823_s18, %s1918_s5 }
 0x14d   : > { %p1429_p13 = scmp.lt.u32.totalorder %s1427_s24, %s1423_s28  ;;  %p1431_p6 = scmp.lt.u32.totalorder %s1423_s28, %s1823_s18 }
 0x14e   : > { %p1425_p2 = pnand %p1424_p1, %p1681_p10 }
 0x14f   : > { %p1430_p4 = por %p1429_p13, %p1428_p7 }
 0x150   : > { %p1426_p3 = pneg %p1425_p2 }
 0x151   : > { %p1432_p8 = por %p1431_p6, %p1430_p4 }
 0x153   : > { %p1433_p12 = pnand %p1432_p8, %p1426_p3 }
 0x155   : > { %1436 = shalt.err (!%p1433_p12)
}
 0x156   : > { %s1544_s17 = smov 128   ;;  %s1545_s16 = smov 8  }
 0x157   : > { %1260 = dma.vmem_to_hbm [thread:$0]  (%p1681_p10), %s1825_s10, 256, %s1823_s18, %s917_s14, %s1544_s17, %s1544_s17, %s1545_s16  }
 0x158   : > { %s922_s7 = scalar_lea.sflag [#allocation9], %s1744_s30  ;;  %s1437_s28 = scalar_lea.vmem %s1832_s19, 256 }
 0x159   : > { %p1438_p11 = scmp.ne.s32.totalorder %s1832_s19, %s1437_s28  ;;  %s1546_s29 = smov [#allocation8]  }
 0x15a   : > { %s1441_s9 = sshll.u32 %s1546_s29, 4  ;;  %s1442_s9 = int_to_ptr.vmem [resolvable:$false] %s1441_s9 }
 0x15b   : > { %p1439_p0 = pnand %p1438_p11, %p1681_p10  ;;  %s1443_s24 = scalar_lea.vmem %s1442_s9, 512 }
 0x15c   : > { %p1444_p9 = scmp.lt.s32.totalorder %s1832_s19, %s1442_s9  ;;  %p1445_p1 = scmp.lt.s32.totalorder %s1443_s24, %s1437_s28 }
 0x15d   : > { %p1440_p5 = pneg %p1439_p0 }
 0x15e   : > { %p1446_p2 = por %p1445_p1, %p1444_p9 }
 0x160   : > { %p1447_p3 = pnand %p1446_p2, %p1440_p5 }
 0x162   : > { %1450 = shalt.err (!%p1447_p3)
}
 0x163   : > { %s1451_s10 = scalar_lea.hbm %s1830_s15, 256  ;;  %s1455_s27 = scalar_lea.hbm %s1919_s6, 512 }
 0x164   : > { %p1452_p7 = scmp.ne.s32.totalorder %s1830_s15, %s1451_s10  ;;  %p1456_p6 = scmp.lt.u32.totalorder %s1830_s15, %s1919_s6 }
 0x165   : > { %p1457_p8 = scmp.lt.u32.totalorder %s1455_s27, %s1451_s10  ;;  %p1459_p11 = scmp.lt.u32.totalorder %s1451_s10, %s1830_s15 }
 0x166   : > { %p1453_p13 = pnand %p1452_p7, %p1681_p10 }
 0x167   : > { %p1458_p12 = por %p1457_p8, %p1456_p6 }
 0x168   : > { %p1454_p4 = pneg %p1453_p13 }
 0x169   : > { %p1460_p0 = por %p1459_p11, %p1458_p12 }
 0x16b   : > { %p1461_p5 = pnand %p1460_p0, %p1454_p4 }
 0x16d   : > { %1464 = shalt.err (!%p1461_p5)
}
 0x16e   : > { %1261 = dma.vmem_to_hbm [thread:$0]  (%p1681_p10), %s1832_s19, 256, %s1830_s15, %s922_s7, %s1544_s17, %s1544_s17, %s1545_s16  }
 0x16f PF: > { %s968_s28 = sand.u32 1, %s1507_s21   ;;  %p1941_p9 = scmp.ne.s32.totalorder %s1929_s8, 0 }
 0x170   : > { %p1942_p1 = scmp.ge.s32.totalorder %s1527_s26, 2  ;;  %s969_s9 = scalar_lea.sflag [#allocation4], %s968_s28 }
 0x172   : > { %p1273_p2 = pnand %p1942_p1, %p1941_p9 }
 0x174   : > { %1498 = dma.done.wait (!%p1273_p2), %s969_s9, 256  }
 0x175   : > { %1500 = vsyncadd (!%p1273_p2), %s969_s9, 4294967040  ;;  %s978_s12 = scalar_lea.sflag [#allocation9], %s968_s28 }
 0x176   : > { %1502 = dma.done.wait (!%p1273_p2), %s978_s12, 256  }
 0x177   : > { %1504 = vsyncadd (!%p1273_p2), %s978_s12, 4294967040  ;;  %s27_s26 = sadd.s32 1, %s1527_s26   ;;  %s1943_s21 = smov %s1511_s22 }
 0x178   : > { %p24_p3 = scmp.ge.s32.totalorder %s27_s26, 4   ;;  %s1944_s22 = smov %s1515_s23 }
 0x179   : > { %s1945_s23 = smov %s1690_s20  ;;  %s1946_s24 = smov %s1523_s25 }
 0x17a   : > { %s1947_s25 = smov %s1949_s13  ;;  %26 = sbr.rel (!%p24_p3) target bundleno = 9 (0x9), region = 117 }
 0x181   :  { %983 = vsyncpa [#allocation3], 1 }
 0x182   :  { %985 = vsyncpa [#allocation3 + $0x1], 1 }
 0x183   :  { %986 = vsyncpa [#allocation6], 1 }
 0x184   :  { %988 = vsyncpa [#allocation6 + $0x1], 1 }
 0x185   :  { %989 = vsyncpa [#allocation4], 1 }
 0x186   :  { %991 = vsyncpa [#allocation4 + $0x1], 1 }
 0x187   :  { %992 = vsyncpa [#allocation9], 1 }
 0x188   :  { %994 = vsyncpa [#allocation9 + $0x1], 1 }

</bundles_post_ra>
